<compile_context>
chip_gen: v7x
topology: tpu7x:2x2x1
jax: 0.10.0
libtpu: 0.0.40
codegen_flags: <defaults>
</compile_context>

<pallas_src>
import jax
import jax.numpy as jnp
from jax.experimental import pallas as pl
from jax.experimental.pallas import tpu as pltpu


_LANE = 128
_TARGET_BLOCK_BYTES = 4 << 20     # ~4 MiB per block (review: 4-8 MiB sweet spot)
_MIN_GRID = 4                     # keep both v7x TCs fed + pipeline overlap
_VMEM_LIMIT_BYTES = 48 << 20      # > working set, < v7x 64 MiB/TC physical VMEM


def _tanh_kernel(x_ref, o_ref):
    # Elementwise tanh on the VMEM tile.  f32 compute is safe on every TPU
    # generation (v5e has no bf16 EUP); the transcendental runs on the EUP
    # slot, which is free under this kernel's HBM-bound roofline.
    x = x_ref[...].astype(jnp.float32)
    o_ref[...] = jnp.tanh(x).astype(o_ref.dtype)


def _pick_cols(main):
    """Widest lane-dense width (multiple of 128) that divides `main` exactly."""
    for cand in (2048, 1024, 512, 256):
        if main % cand == 0:
            return cand
    return _LANE


def _pick_tm(rows, cols, itemsize):
    """Row-tile: ~4 MiB blocks, sublane-granule aligned, >= _MIN_GRID tiles."""
    sub = max(8, 32 // itemsize)          # sublane packing granule (8 f32, 16 bf16)
    if rows <= sub:
        return rows                       # full extent (valid even if < 8)
    tm = _TARGET_BLOCK_BYTES // (cols * itemsize)
    tm = max(sub, min(tm, rows))
    # Shrink until both v7x TensorCores get work and the pipeline has steps.
    while tm > sub and pl.cdiv(rows, tm) < _MIN_GRID:
        tm = max(sub, tm // 2)
    tm = max(sub, (tm // sub) * sub)      # multiple of the sublane granule
    return tm


def _tanh_pallas_2d(x2d, *, total_elems, donate):
    rows, cols = x2d.shape
    itemsize = jnp.dtype(x2d.dtype).itemsize
    tm = _pick_tm(rows, cols, itemsize)
    grid = (pl.cdiv(rows, tm),)           # partial last block -> masked writes

    return pl.pallas_call(
        _tanh_kernel,
        out_shape=jax.ShapeDtypeStruct((rows, cols), x2d.dtype),
        grid=grid,
        in_specs=[pl.BlockSpec((tm, cols), lambda i: (i, 0))],
        out_specs=pl.BlockSpec((tm, cols), lambda i: (i, 0)),
        compiler_params=pltpu.CompilerParams(
            dimension_semantics=("parallel",),
            vmem_limit_bytes=_VMEM_LIMIT_BYTES,
        ),
        cost_estimate=pl.CostEstimate(
            flops=0,
            transcendentals=total_elems,
            bytes_accessed=2 * total_elems * itemsize,
        ),
        input_output_aliases=({0: 0} if donate else {}),
    )(x2d)


def igdn2d_forward(x, conv_weight=None, conv_bias=None, eps=1e-9, donate=False):
    """IGDN2d.forward(input) == tanh(input).

    conv_weight / conv_bias / eps are accepted for interface fidelity with the
    PyTorch module but are unused (the torch forward returns before the conv).
    Set donate=True only if the caller donates x (enables in-place HBM reuse).
    """
    if not jnp.issubdtype(x.dtype, jnp.floating):
        raise TypeError(f"igdn2d_forward expects a floating dtype, got {x.dtype}")

    orig_shape = x.shape
    orig_dtype = x.dtype
    total = int(x.size)
    if total == 0:
        return x

    flat = x.reshape(total)               # reshape of contiguous array: free
    main = (total // _LANE) * _LANE
    tail = total - main

    if main == 0:
        # Fewer than 128 elements: a kernel launch is not worth it.
        return jnp.tanh(flat.astype(jnp.float32)).astype(orig_dtype).reshape(orig_shape)

    cols = _pick_cols(main)
    rows = main // cols

    if tail == 0:
        # Fast path (typical NCHW activations): zero extra HBM passes.
        out2d = _tanh_pallas_2d(flat.reshape(rows, cols),
                                total_elems=total, donate=donate)
        return out2d.reshape(orig_shape)

    # Ragged fallback: kernel on the lane-dense main part, plain tanh on the
    # < 128-element tail.  The concatenate costs one extra pass over the
    # output, which is still cheaper than the old pad + slice (two passes).
    main_out = _tanh_pallas_2d(flat[:main].reshape(rows, cols),
                               total_elems=main, donate=False)
    tail_out = jnp.tanh(flat[main:].astype(jnp.float32)).astype(orig_dtype)
    out_flat = jnp.concatenate([main_out.reshape(main), tail_out])
    return out_flat.reshape(orig_shape)


def init_igdn2d_params(num_features, key):
    """Deterministic init of the (unused-in-forward) 1x1 conv parameters.

    Mirrors nn.Conv2d(num_features, num_features, kernel_size=1):
      weight: (C_out, C_in, 1, 1), bias: (C_out,)
    """
    kw, kb = jax.random.split(key)
    fan_in = num_features  # C_in * 1 * 1
    bound = 1.0 / (fan_in ** 0.5)
    weight = jax.random.uniform(
        kw, (num_features, num_features, 1, 1), jnp.float32, -bound, bound
    )
    bias = jax.random.uniform(kb, (num_features,), jnp.float32, -bound, bound)
    return weight, bias


if __name__ == "__main__":
    key = jax.random.PRNGKey(0)
    k_x, k_p = jax.random.split(key)

    N, C, H, W = 2, 4, 16, 16
    x = jax.random.normal(k_x, (N, C, H, W), dtype=jnp.float32)

    # Module parameters (created for shape fidelity; unused in forward).
    conv_w, conv_b = init_igdn2d_params(C, k_p)

    out = igdn2d_forward(x, conv_w, conv_b)
    out = jax.block_until_ready(out)

    ref = jnp.tanh(x)
    assert out.shape == x.shape and out.dtype == x.dtype
    assert jnp.allclose(out, ref, atol=1e-6, rtol=1e-6)

    # Extra sanity check: ragged shape exercising the partial-block grid and
    # the <128-element tail fallback path.
    x2 = jax.random.normal(key, (3, 5, 7, 11), dtype=jnp.float32)
    out2 = jax.block_until_ready(igdn2d_forward(x2))
    assert jnp.allclose(out2, jnp.tanh(x2), atol=1e-6, rtol=1e-6)

    print("KERNEL_OK")
</pallas_src>

<mosaic_0001>
module attributes {stable_mosaic.version = 11 : i64} {
  func.func @_tanh_kernel(%arg0: i32, %arg1: memref<1x2048xf32, #tpu.memory_space<vmem>>, %arg2: memref<1x2048xf32, #tpu.memory_space<vmem>>) attributes {dimension_semantics = [#tpu.dimension_semantics<parallel>], iteration_bounds = array<i64: 1>, scalar_prefetch = 0 : i64, scratch_operands = 0 : i64, tpu.core_type = #tpu.core_type<tc>, window_params = [{transform_indices = @transform_0, window_bounds = array<i64: 1, 2048>}, {transform_indices = @transform_1, window_bounds = array<i64: 1, 2048>}]} {
    %c0 = arith.constant 0 : index
    %c0_0 = arith.constant 0 : index
    %0 = vector.load %arg1[%c0, %c0_0] : memref<1x2048xf32, #tpu.memory_space<vmem>>, vector<1x2048xf32>
    %1 = math.tanh %0 : vector<1x2048xf32>
    %c0_1 = arith.constant 0 : index
    %c0_2 = arith.constant 0 : index
    %2 = vector.load %arg2[%c0_1, %c0_2] : memref<1x2048xf32, #tpu.memory_space<vmem>>, vector<1x2048xf32>
    tpu.vector_store %arg2[%c0_1, %c0_2], %1 {strides = array<i32>} : memref<1x2048xf32, #tpu.memory_space<vmem>>, vector<1x2048xf32>,
    return
  }
  func.func @transform_0(%arg0: i32) -> (i32, i32) {
    %c0_i32 = arith.constant 0 : i32
    %c0_i32_0 = arith.constant 0 : i32
    return %arg0, %c0_i32 : i32, i32
  }
  func.func @transform_1(%arg0: i32) -> (i32, i32) {
    %c0_i32 = arith.constant 0 : i32
    %c0_i32_0 = arith.constant 0 : i32
    return %arg0, %c0_i32 : i32, i32
  }
}

</mosaic_0001>

<bundles_post_ra>
// kernel: tpu_custom_call.1
= control target key start
LH: loop header
LB: loop body
LE: loop exit
PB: predicated region body
PF: predicated region fallthrough
CT: control target
= control target key end

     0   :  { %6 = vsyncpa [#allocation3], 0  ;;  %s132_s0 = inlined_call_operand.hbm [shape: f32[1,2048], index: 0, kind: input, shape index: {}]   ;;  %s133_s1 = inlined_call_operand.hbm [shape: f32[1,2048], index: 1, kind: output, shape index: {}]  }
   0x1   :  { %7 = vsyncpa [#allocation4], 0  ;;  %s96_s6 = smov [#allocation2]   ;;  %s48_s10 = scalar_lea.hbm %s132_s0, 256 }
   0x2   :  { %s14_s7 = sshll.u32 %s96_s6, 4  ;;  %p49_p0 = scmp.ne.s32.totalorder %s132_s0, %s48_s10  ;;  %s15_s7 = int_to_ptr.vmem [resolvable:$true] %s14_s7 }
   0x3   :  { %p52_p1 = scmp.lt.u32.totalorder %s48_s10, %s132_s0 }
   0x5   :  { %p54_p2 = pnand %p52_p1, %p49_p0 }
   0x7   :  { %57 = shalt.err (!%p54_p2)
}
   0x8   :  { %s58_s15 = scalar_lea.vmem %s15_s7, 256  ;;  %p63_p4 = scmp.lt.s32.totalorder %s15_s7, %s15_s7 }
   0x9   :  { %p59_p3 = scmp.ne.s32.totalorder %s15_s7, %s58_s15  ;;  %p64_p5 = scmp.lt.s32.totalorder %s58_s15, %s58_s15 }
   0xb   :  { %p65_p6 = por %p64_p5, %p63_p4 }
   0xd   :  { %p66_p7 = pnand %p65_p6, %p59_p3 }
   0xf   :  { %69 = shalt.err (!%p66_p7)
}
  0x10   :  { %17 = dma.hbm_to_vmem [thread:$0]  %s132_s0, 256, %s15_s7, [#allocation3]  }
  0x11   :  { %92 = dma.done.wait [#allocation3], 256  }
  0x12   :  { %93 = vsyncadd [#allocation3], 4294967040  ;;  %v21_v0 = vld [vmem:[#allocation2] sm:$0xff]  ;;  %v22_v1 = vld [vmem:[#allocation2 + $0x8] sm:$0xff]  ;;  %s97_s18 = smov [#allocation5]  }
  0x13   :  { %44 = vtanh.f32 %v21_v0  ;;  %s33_s19 = sshll.u32 %s97_s18, 4  ;;  %s34_s19 = int_to_ptr.vmem [resolvable:$true] %s33_s19 }
  0x14   :  { %46 = vtanh.f32 %v22_v1  ;;  %s70_s20 = scalar_lea.vmem %s34_s19, 256  ;;  %p75_p9 = scmp.lt.s32.totalorder %s34_s19, %s34_s19 }
  0x15   :  { %p71_p8 = scmp.ne.s32.totalorder %s34_s19, %s70_s20  ;;  %p76_p10 = scmp.lt.s32.totalorder %s70_s20, %s70_s20 }
  0x17   :  { %p77_p11 = por %p76_p10, %p75_p9 }
  0x19   :  { %p78_p12 = pnand %p77_p11, %p71_p8 }
  0x1d   :  { %v45_v2 = vpop.eup %44 }
  0x1e   :  { %v47_v3 = vpop.eup %46  ;;  %25 = vst [vmem:[#allocation5] sm:$0xff] %v45_v2 }
  0x1f   :  { %26 = vst [vmem:[#allocation5 + $0x8] sm:$0xff] %v47_v3 }
  0x20   :  { %81 = shalt.err (!%p78_p12)
}
  0x21   :  { %s82_s22 = scalar_lea.hbm %s133_s1, 256 }
  0x22   :  { %p83_p13 = scmp.ne.s32.totalorder %s133_s1, %s82_s22  ;;  %p86_p0 = scmp.lt.u32.totalorder %s82_s22, %s133_s1 }
  0x24   :  { %p88_p1 = pnand %p86_p0, %p83_p13 }
  0x26   :  { %91 = shalt.err (!%p88_p1)
}
  0x27   :  { %36 = dma.vmem_to_hbm [thread:$0]  %s34_s19, 256, %s133_s1, [#allocation4]  }
  0x28   :  { %94 = dma.done.wait [#allocation4], 256  }
  0x29   :  { %95 = vsyncadd [#allocation4], 4294967040 }
  0x2a   :  { %40 = vsyncpa [#allocation3], 1 }
  0x2b   :  { %41 = vsyncpa [#allocation4], 1 }

</bundles_post_ra>
